<compile_context>
chip_gen: v7x
topology: tpu7x:2x2x1
jax: 0.10.0
libtpu: 0.0.40
codegen_flags: <defaults>
</compile_context>

<pallas_src>
import jax
import jax.numpy as jnp
from jax.experimental import pallas as pl
from jax.experimental.pallas import tpu as pltpu


_TILE_BYTE_BUDGET = 6 * 1024 * 1024   # per x / out buffer (x4 double-buffered ~ 24 MiB)
_MAX_BLOCK_ROWS = 4096                # keeps the lane-padded (rows, 2) scale tile small
_VMEM_LIMIT_BYTES = 40 * 1024 * 1024  # comfortably inside v7x's 64 MiB physical VMEM


def _normalize_kernel(x_ref, scale_ref, o_ref):
    # x_ref / o_ref: (BR, BC) tiles.  scale_ref: (BR, 2) f32 per-row constants,
    # column 0 = mean, column 1 = 1/std (broadcast along lanes by the VPU).
    # Compute in f32, cast only on the store.
    x = x_ref[...].astype(jnp.float32)
    mean = scale_ref[:, 0:1]
    inv_std = scale_ref[:, 1:2]
    o_ref[...] = ((x - mean) * inv_std).astype(o_ref.dtype)


def _choose_blocks(rows, cols, itemsize):
    """Byte-budgeted, packing-aligned (rows, cols) block shape."""
    # Sublane packing alignment: 8 for f32, 16 for bf16, 32 for 8-bit dtypes.
    row_align = max(8, 32 // itemsize)

    # Prefer a full-width column block: widest lane-dense stores, no column
    # grid axis in practice.  (H*W < 128 stays correct, just masked stores.)
    if cols <= 128 or cols * row_align * itemsize <= _TILE_BYTE_BUDGET:
        block_cols = cols
    else:
        # Column tiling needed: largest multiple of 128 under the budget that
        # divides cols evenly (no masked remainder block); else largest
        # multiple of 128 under the budget.
        max_cols = max(
            128, (_TILE_BYTE_BUDGET // (row_align * itemsize)) // 128 * 128
        )
        block_cols = next(
            (c for c in range(max_cols, 127, -128) if cols % c == 0), max_cols
        )

    if rows * block_cols * itemsize <= _TILE_BYTE_BUDGET and rows <= _MAX_BLOCK_ROWS:
        block_rows = rows                      # full extent: always legal
    else:
        br = (_TILE_BYTE_BUDGET // (block_cols * itemsize)) // row_align * row_align
        br = max(row_align, br)
        block_rows = min(br, _MAX_BLOCK_ROWS)
        if block_rows >= rows:                 # never exceed the array extent
            block_rows = rows
    return int(block_rows), int(block_cols)


def normalize(x, mean, std):
    """x: (N, C, H, W); mean, std: (C,). Returns (x - mean[c]) / std[c]."""
    N, C, H, W = x.shape
    assert C == mean.shape[0] == std.shape[0]

    rows, cols = N * C, H * W
    x2 = x.reshape(rows, cols)   # free reshape for contiguous NCHW

    # Per-row channel constants packed into one (rows, 2) f32 array:
    # one small DMA per row block, resident across the inner column axis.
    mean_f32 = mean.astype(jnp.float32)
    inv_std_f32 = 1.0 / std.astype(jnp.float32)
    scale = jnp.broadcast_to(
        jnp.stack([mean_f32, inv_std_f32], axis=-1)[None, :, :], (N, C, 2)
    ).reshape(rows, 2)

    itemsize = jnp.dtype(x.dtype).itemsize
    block_rows, block_cols = _choose_blocks(rows, cols, itemsize)

    # Row axis outer, column axis innermost: keeps the (i, 0) scale block
    # resident across the inner column loop.  Do not reorder.
    grid = (pl.cdiv(rows, block_rows), pl.cdiv(cols, block_cols))

    out2 = pl.pallas_call(
        _normalize_kernel,
        out_shape=jax.ShapeDtypeStruct((rows, cols), x.dtype),
        grid=grid,
        in_specs=[
            pl.BlockSpec((block_rows, block_cols), lambda i, j: (i, j)),
            pl.BlockSpec((block_rows, 2), lambda i, j: (i, 0)),
        ],
        out_specs=pl.BlockSpec((block_rows, block_cols), lambda i, j: (i, j)),
        compiler_params=pltpu.CompilerParams(
            # Pure streaming op, no reduction: both axes independent.
            # TODO(synk): on v7x (2 TCs/chip) consider CORE_PARALLEL on the
            # row axis once verified; "parallel" kept for portability.
            dimension_semantics=("parallel", "parallel"),
            vmem_limit_bytes=_VMEM_LIMIT_BYTES,
        ),
    )(x2, scale)

    return out2.reshape(N, C, H, W)


if __name__ == "__main__":
    key = jax.random.PRNGKey(0)

    # Deterministic "registered buffers" (ImageNet-style stats, C=3 per spec).
    mean = jnp.array([0.485, 0.456, 0.406], dtype=jnp.float32)
    std = jnp.array([0.229, 0.224, 0.225], dtype=jnp.float32)

    # Small f32 case matching the module's expected NCHW layout.
    N, C, H, W = 2, 3, 16, 16
    x = jax.random.uniform(key, (N, C, H, W), dtype=jnp.float32)
    out = jax.block_until_ready(normalize(x, mean, std))
    ref = (x - mean.reshape(1, 3, 1, 1)) / std.reshape(1, 3, 1, 1)
    assert jnp.allclose(out, ref, atol=1e-6, rtol=1e-6)

    # bf16 case: exercises the dtype-aware (byte-budgeted) tile sizing and the
    # f32-compute / low-precision-store path.
    xb = jax.random.uniform(
        jax.random.PRNGKey(1), (2, 3, 64, 64), dtype=jnp.float32
    ).astype(jnp.bfloat16)
    outb = jax.block_until_ready(normalize(xb, mean, std))
    refb = (xb.astype(jnp.float32) - mean.reshape(1, 3, 1, 1)) / std.reshape(
        1, 3, 1, 1
    )
    assert jnp.allclose(outb.astype(jnp.float32), refb, atol=5e-2, rtol=5e-2)

    print("KERNEL_OK")
</pallas_src>

<mosaic_0001>
module attributes {stable_mosaic.version = 11 : i64} {
  func.func @_normalize_kernel(%arg0: i32, %arg1: i32, %arg2: memref<6x256xf32, #tpu.memory_space<vmem>>, %arg3: memref<6x2xf32, #tpu.memory_space<vmem>>, %arg4: memref<6x256xf32, #tpu.memory_space<vmem>>) attributes {dimension_semantics = [#tpu.dimension_semantics<parallel>, #tpu.dimension_semantics<parallel>], iteration_bounds = array<i64: 1, 1>, scalar_prefetch = 0 : i64, scratch_operands = 0 : i64, tpu.core_type = #tpu.core_type<tc>, window_params = [{transform_indices = @transform_0, window_bounds = array<i64: 6, 256>}, {transform_indices = @transform_1, window_bounds = array<i64: 6, 2>}, {transform_indices = @transform_2, window_bounds = array<i64: 6, 256>}]} {
    %c0 = arith.constant 0 : index
    %c0_0 = arith.constant 0 : index
    %0 = vector.load %arg2[%c0, %c0_0] : memref<6x256xf32, #tpu.memory_space<vmem>>, vector<6x256xf32>
    %c0_1 = arith.constant 0 : index
    %c0_2 = arith.constant 0 : index
    %1 = vector.load %arg3[%c0_1, %c0_2] : memref<6x2xf32, #tpu.memory_space<vmem>>, vector<6x1xf32>
    %c0_3 = arith.constant 0 : index
    %c1 = arith.constant 1 : index
    %2 = vector.load %arg3[%c0_3, %c1] : memref<6x2xf32, #tpu.memory_space<vmem>>, vector<6x1xf32>
    %3 = vector.broadcast %1 : vector<6x1xf32> to vector<6x256xf32>
    %4 = arith.subf %0, %3 : vector<6x256xf32>
    %5 = vector.broadcast %2 : vector<6x1xf32> to vector<6x256xf32>
    %6 = arith.mulf %4, %5 : vector<6x256xf32>
    %c0_4 = arith.constant 0 : index
    %c0_5 = arith.constant 0 : index
    %7 = vector.load %arg4[%c0_4, %c0_5] : memref<6x256xf32, #tpu.memory_space<vmem>>, vector<6x256xf32>
    tpu.vector_store %arg4[%c0_4, %c0_5], %6 {strides = array<i32>} : memref<6x256xf32, #tpu.memory_space<vmem>>, vector<6x256xf32>,
    return
  }
  func.func @transform_0(%arg0: i32, %arg1: i32) -> (i32, i32) {
    %c0_i32 = arith.constant 0 : i32
    return %arg0, %arg1 : i32, i32
  }
  func.func @transform_1(%arg0: i32, %arg1: i32) -> (i32, i32) {
    %c0_i32 = arith.constant 0 : i32
    %c0_i32_0 = arith.constant 0 : i32
    return %arg0, %c0_i32 : i32, i32
  }
  func.func @transform_2(%arg0: i32, %arg1: i32) -> (i32, i32) {
    %c0_i32 = arith.constant 0 : i32
    return %arg0, %arg1 : i32, i32
  }
}

</mosaic_0001>

<bundles_post_ra>
// kernel: tpu_custom_call.1
= control target key start
LH: loop header
LB: loop body
LE: loop exit
PB: predicated region body
PF: predicated region fallthrough
CT: control target
= control target key end

     0   :  { %7 = vsyncpa [#allocation3], 0  ;;  %s157_s0 = inlined_call_operand.hbm [shape: f32[6,256], index: 0, kind: input, shape index: {}]   ;;  %s158_s1 = inlined_call_operand.vmem [shape: f32[6,2], index: 1, kind: input, shape index: {}]   ;;  %s159_s2 = inlined_call_operand.hbm [shape: f32[6,256], index: 2, kind: output, shape index: {}]  }
   0x1   :  { %8 = vsyncpa [#allocation4], 0  ;;  %s111_s9 = smov [#allocation2]   ;;  %s63_s13 = scalar_lea.hbm %s157_s0, 256 }
   0x2   :  { %s15_s10 = sshll.u32 %s111_s9, 4  ;;  %p64_p0 = scmp.ne.s32.totalorder %s157_s0, %s63_s13  ;;  %s16_s10 = int_to_ptr.vmem [resolvable:$true] %s15_s10 }
   0x3   :  { %p67_p1 = scmp.lt.u32.totalorder %s63_s13, %s157_s0 }
   0x5   :  { %p69_p2 = pnand %p67_p1, %p64_p0 }
   0x7   :  { %72 = shalt.err (!%p69_p2)
}
   0x8   :  { %s73_s18 = scalar_lea.vmem %s16_s10, 256  ;;  %p78_p4 = scmp.lt.s32.totalorder %s16_s10, %s16_s10 }
   0x9   :  { %p74_p3 = scmp.ne.s32.totalorder %s16_s10, %s73_s18  ;;  %p79_p5 = scmp.lt.s32.totalorder %s73_s18, %s73_s18 }
   0xb   :  { %p80_p6 = por %p79_p5, %p78_p4 }
   0xd   :  { %p81_p7 = pnand %p80_p6, %p74_p3 }
   0xf   :  { %84 = shalt.err (!%p81_p7)
}
  0x10   :  { %18 = dma.hbm_to_vmem [thread:$0]  %s157_s0, 256, %s16_s10, [#allocation3]  }
  0x11   :  { %107 = dma.done.wait [#allocation3], 256  }
  0x12   :  { %108 = vsyncadd [#allocation3], 4294967040  ;;  %v112_v0 = vmov 0   ;;  %v26_v1 = vld [vmem:[%s158_s1] sm:$0x3f]  ;;  %v113_v2 = vmov 1  }
  0x13   :  { %61 = vset.pattern.permute.xlu0 %v112_v0  ;;  %v24_v4 = vld [vmem:[#allocation2] sm:$0x3f]  ;;  %v25_v5 = vld [vmem:[#allocation2 + $0x8] sm:$0x3f]  ;;  %s114_s23 = smov [#allocation5]  }
  0x14   :  { %29 = vperm.xlu0 %61, %v26_v1   ;;  %s48_s24 = sshll.u32 %s114_s23, 4  ;;  %s49_s24 = int_to_ptr.vmem [resolvable:$true] %s48_s24 }
  0x15   :  { %s85_s0 = scalar_lea.vmem %s49_s24, 256  ;;  %p90_p9 = scmp.lt.s32.totalorder %s49_s24, %s49_s24 }
  0x16   :  { %p86_p8 = scmp.ne.s32.totalorder %s49_s24, %s85_s0  ;;  %p91_p10 = scmp.lt.s32.totalorder %s85_s0, %s85_s0 }
  0x18   :  { %62 = vset.pattern.permute.xlu0 %v113_v2  ;;  %p92_p11 = por %p91_p10, %p90_p9 }
  0x19   :  { %35 = vperm.xlu0 %62, %v26_v1  }
  0x1a   :  { %p93_p12 = pnand %p92_p11, %p86_p8 }
  0x93   :  { %v30_v3 = vpop.permute.xlu0 %29 }
  0x94   :  { %v32_v6 = vsub.f32 %v24_v4, %v30_v3  ;;  %v33_v7 = vsub.f32 %v25_v5, %v30_v3 }
  0x98   :  { %v36_v8 = vpop.permute.xlu0 %35 }
  0x99   :  { %v38_v9 = vmul.f32 %v36_v8, %v32_v6  ;;  %v39_v10 = vmul.f32 %v36_v8, %v33_v7 }
  0x9b   :  { %40 = vst [vmem:[#allocation5] sm:$0x3f] %v38_v9  ;;  %41 = vst [vmem:[#allocation5 + $0x8] sm:$0x3f] %v39_v10 }
  0x9c   :  { %96 = shalt.err (!%p93_p12)
}
  0x9d   :  { %s97_s26 = scalar_lea.hbm %s159_s2, 256 }
  0x9e   :  { %p98_p13 = scmp.ne.s32.totalorder %s159_s2, %s97_s26  ;;  %p101_p0 = scmp.lt.u32.totalorder %s97_s26, %s159_s2 }
  0xa0   :  { %p103_p1 = pnand %p101_p0, %p98_p13 }
  0xa2   :  { %106 = shalt.err (!%p103_p1)
}
  0xa3   :  { %51 = dma.vmem_to_hbm [thread:$0]  %s49_s24, 256, %s159_s2, [#allocation4]  }
  0xa4   :  { %109 = dma.done.wait [#allocation4], 256  }
  0xa5   :  { %110 = vsyncadd [#allocation4], 4294967040 }
  0xa6   :  { %55 = vsyncpa [#allocation3], 1 }
  0xa7   :  { %56 = vsyncpa [#allocation4], 1 }

</bundles_post_ra>
